<compile_context>
chip_gen: v7x
topology: tpu7x:2x2x1
jax: 0.10.0
libtpu: 0.0.40
codegen_flags: <defaults>
</compile_context>

<pallas_src>
import jax
import jax.numpy as jnp
from jax.experimental import pallas as pl
from jax.experimental.pallas import tpu as pltpu


LANES = 128
SUBLANES = 8
N_CORES = 2  # 2-way "parallel" split: uses both TCs on v7x, harmless on v5e/v6e


def _ceil_div(a, b):
    return -(-a // b)


def _round_up(a, b):
    return _ceil_div(a, b) * b


def ner_loss_kernel(pred_ref, tgt_ref, out_ref, acc_ref):
    # Grid: (core, row_block). acc_ref is an (8, 128) f32 VMEM accumulator that
    # lives across the (arbitrary) row_block axis; out_ref is this core's
    # (1, 8, 128) partial-sum block.
    i = pl.program_id(1)

    @pl.when(i == 0)
    def _():
        acc_ref[...] = jnp.zeros_like(acc_ref)

    x = pred_ref[...].astype(jnp.float32)   # (br, 128) logits
    s = tgt_ref[...].astype(jnp.float32)    # (br, 128) signed target: mask*(2y-1)

    m = jnp.abs(s)                          # mask in {0, 1}
    y = 0.5 * (s + 1.0)                     # target in {0, 1} wherever m == 1

    # Numerically-stable BCE-with-logits (matches torch.nn.BCEWithLogitsLoss):
    #   l = max(x, 0) - x*y + log(1 + exp(-|x|))
    per_elem = jnp.maximum(x, 0.0) - x * y + jnp.log1p(jnp.exp(-jnp.abs(x)))
    masked = per_elem * m

    # Vreg-shaped partial sum: pure element-wise adds each step
    # (no cross-lane reduce inside the hot loop).
    acc_ref[...] += masked.reshape(-1, SUBLANES, LANES).sum(axis=0)

    @pl.when(i == pl.num_programs(1) - 1)
    def _():
        out_ref[...] = acc_ref[...].reshape(out_ref.shape)


def ner_loss(predictions, groundtruth, mask, *, block_rows=4096):
    """predictions, groundtruth: (B, T, T, C); mask: (B, T, T). Returns scalar f32."""
    B, T1, T2, C = predictions.shape
    assert groundtruth.shape == predictions.shape
    assert mask.shape == (B, T1, T2)

    N = B * T1 * T2
    E = N * C

    rows = _ceil_div(E, LANES)
    # Row tile: multiple of 8, no bigger than what one core needs.
    br = min(block_rows, _round_up(_ceil_div(rows, N_CORES), SUBLANES))
    br = max(SUBLANES, _round_up(br, SUBLANES))
    blocks_per_core = _ceil_div(rows, N_CORES * br)
    padded_rows = N_CORES * blocks_per_core * br
    padded_E = padded_rows * LANES

    # Lane-dense logit stream.
    pred_flat = predictions.reshape(-1)

    # Single signed target stream: mask * (2*y - 1) in {-1, 0, +1} (exact bf16).
    signed = (
        (2.0 * groundtruth.astype(jnp.float32) - 1.0)
        * mask.astype(jnp.float32)[..., None]
    ).astype(jnp.bfloat16).reshape(-1)

    pad = padded_E - E
    if pad:
        # Zero padding: s == 0 (mask 0) there, so padded elements contribute 0.
        pred_flat = jnp.pad(pred_flat, (0, pad))
        signed = jnp.pad(signed, (0, pad))

    pred2d = pred_flat.reshape(padded_rows, LANES)
    tgt2d = signed.reshape(padded_rows, LANES)

    bpc = blocks_per_core
    in_map = lambda p, i: (p * bpc + i, 0)

    partials = pl.pallas_call(
        ner_loss_kernel,
        out_shape=jax.ShapeDtypeStruct((N_CORES, SUBLANES, LANES), jnp.float32),
        grid_spec=pltpu.PrefetchScalarGridSpec(
            num_scalar_prefetch=0,
            grid=(N_CORES, bpc),
            in_specs=[
                pl.BlockSpec((br, LANES), in_map),
                pl.BlockSpec((br, LANES), in_map),
            ],
            out_specs=pl.BlockSpec((1, SUBLANES, LANES), lambda p, i: (p, 0, 0)),
            scratch_shapes=[pltpu.VMEM((SUBLANES, LANES), jnp.float32)],
        ),
        compiler_params=pltpu.CompilerParams(
            dimension_semantics=("parallel", "arbitrary"),
        ),
    )(pred2d, tgt2d)

    # Final tiny reduction of the (2, 8, 128) per-core partial sums.
    return partials.sum()


def ner_loss_ref(predictions, groundtruth, mask):
    x = predictions.astype(jnp.float32)
    y = groundtruth.astype(jnp.float32)
    per_elem = jnp.maximum(x, 0.0) - x * y + jnp.log1p(jnp.exp(-jnp.abs(x)))
    loss = per_elem.sum(-1)
    return (loss * mask.astype(jnp.float32)).sum()


if __name__ == "__main__":
    # Small shapes consistent with the module: Batch x MaxToken x MaxToken x Classes
    B, T, C = 2, 8, 4
    key = jax.random.PRNGKey(0)
    k1, k2, k3 = jax.random.split(key, 3)

    predictions = jax.random.normal(k1, (B, T, T, C), dtype=jnp.float32)
    groundtruth = (jax.random.uniform(k2, (B, T, T, C)) > 0.7).astype(jnp.float32)
    mask = (jax.random.uniform(k3, (B, T, T)) > 0.3).astype(jnp.float32)

    out = ner_loss(predictions, groundtruth, mask)
    out = jax.block_until_ready(out)

    ref = ner_loss_ref(predictions, groundtruth, mask)
    assert jnp.allclose(out, ref, rtol=1e-5, atol=1e-5), (out, ref)

    print("KERNEL_OK")
</pallas_src>

<mosaic_0001>
module attributes {stable_mosaic.version = 11 : i64} {
  func.func @ner_loss_kernel(%arg0: i32, %arg1: i32, %arg2: memref<8x128xf32, #tpu.memory_space<vmem>>, %arg3: memref<8x128xbf16, #tpu.memory_space<vmem>>, %arg4: memref<1x8x128xf32, #tpu.memory_space<vmem>>, %arg5: memref<8x128xf32, #tpu.memory_space<vmem>>) attributes {dimension_semantics = [#tpu.dimension_semantics<parallel>, #tpu.dimension_semantics<arbitrary>], iteration_bounds = array<i64: 2, 1>, scalar_prefetch = 0 : i64, scratch_operands = 1 : i64, tpu.core_type = #tpu.core_type<tc>, window_params = [{transform_indices = @transform_0, window_bounds = array<i64: 8, 128>}, {transform_indices = @transform_1, window_bounds = array<i64: 8, 128>}, {transform_indices = @transform_2, window_bounds = array<i64: 1, 8, 128>}]} {
    %c0_i32 = arith.constant 0 : i32
    %0 = arith.cmpi eq, %arg1, %c0_i32 : i32
    %1 = arith.extui %0 : i1 to i32
    %c0_i32_0 = arith.constant 0 : i32
    %2 = arith.cmpi ne, %1, %c0_i32_0 : i32
    scf.if %2 {
      %cst_14 = arith.constant 0.000000e+00 : f32
      %30 = vector.broadcast %cst_14 : f32 to vector<8x128xf32>
      %c0_15 = arith.constant 0 : index
      %c0_16 = arith.constant 0 : index
      %31 = vector.load %arg5[%c0_15, %c0_16] : memref<8x128xf32, #tpu.memory_space<vmem>>, vector<8x128xf32>
      tpu.vector_store %arg5[%c0_15, %c0_16], %30 {strides = array<i32>} : memref<8x128xf32, #tpu.memory_space<vmem>>, vector<8x128xf32>,
    } else {
    }
    %c0 = arith.constant 0 : index
    %c0_1 = arith.constant 0 : index
    %3 = vector.load %arg2[%c0, %c0_1] : memref<8x128xf32, #tpu.memory_space<vmem>>, vector<8x128xf32>
    %c0_2 = arith.constant 0 : index
    %c0_3 = arith.constant 0 : index
    %4 = vector.load %arg3[%c0_2, %c0_3] : memref<8x128xbf16, #tpu.memory_space<vmem>>, vector<8x128xbf16>
    %5 = arith.extf %4 : vector<8x128xbf16> to vector<8x128xf32>
    %6 = math.absf %5 : vector<8x128xf32>
    %cst = arith.constant 1.000000e+00 : f32
    %7 = vector.broadcast %cst : f32 to vector<8x128xf32>
    %8 = arith.addf %5, %7 : vector<8x128xf32>
    %cst_4 = arith.constant 5.000000e-01 : f32
    %9 = vector.broadcast %cst_4 : f32 to vector<8x128xf32>
    %10 = arith.mulf %9, %8 : vector<8x128xf32>
    %cst_5 = arith.constant 0.000000e+00 : f32
    %11 = vector.broadcast %cst_5 : f32 to vector<8x128xf32>
    %12 = arith.maximumf %3, %11 : vector<8x128xf32>
    %13 = arith.mulf %3, %10 : vector<8x128xf32>
    %14 = arith.subf %12, %13 : vector<8x128xf32>
    %15 = math.absf %3 : vector<8x128xf32>
    %cst_6 = arith.constant 0.000000e+00 : f32
    %16 = vector.broadcast %cst_6 : f32 to vector<8x128xf32>
    %17 = arith.subf %16, %15 : vector<8x128xf32>
    %18 = math.exp %17 : vector<8x128xf32>
    %19 = math.log1p %18 : vector<8x128xf32>
    %20 = arith.addf %14, %19 : vector<8x128xf32>
    %21 = arith.mulf %20, %6 : vector<8x128xf32>
    %c0_7 = arith.constant 0 : index
    %c0_8 = arith.constant 0 : index
    %22 = vector.load %arg5[%c0_7, %c0_8] : memref<8x128xf32, #tpu.memory_space<vmem>>, vector<8x128xf32>
    %23 = vector.shape_cast %21 : vector<8x128xf32> to vector<1x8x128xf32>
    %cst_9 = arith.constant dense<0.000000e+00> : vector<8x128xf32>
    %24 = vector.multi_reduction <add>, %23, %cst_9 [0] : vector<1x8x128xf32> to vector<8x128xf32>
    %25 = arith.addf %22, %24 : vector<8x128xf32>
    %c0_10 = arith.constant 0 : index
    %c0_11 = arith.constant 0 : index
    %26 = vector.load %arg5[%c0_10, %c0_11] : memref<8x128xf32, #tpu.memory_space<vmem>>, vector<8x128xf32>
    tpu.vector_store %arg5[%c0_10, %c0_11], %25 {strides = array<i32>} : memref<8x128xf32, #tpu.memory_space<vmem>>, vector<8x128xf32>,
    %c0_i32_12 = arith.constant 0 : i32
    %27 = arith.cmpi eq, %arg1, %c0_i32_12 : i32
    %28 = arith.extui %27 : i1 to i32
    %c0_i32_13 = arith.constant 0 : i32
    %29 = arith.cmpi ne, %28, %c0_i32_13 : i32
    scf.if %29 {
      %c0_14 = arith.constant 0 : index
      %c0_15 = arith.constant 0 : index
      %30 = vector.load %arg5[%c0_14, %c0_15] : memref<8x128xf32, #tpu.memory_space<vmem>>, vector<8x128xf32>
      %31 = vector.shape_cast %30 : vector<8x128xf32> to vector<1x8x128xf32>
      %c0_16 = arith.constant 0 : index
      %c0_17 = arith.constant 0 : index
      %c0_18 = arith.constant 0 : index
      %32 = vector.load %arg4[%c0_16, %c0_17, %c0_18] : memref<1x8x128xf32, #tpu.memory_space<vmem>>, vector<1x8x128xf32>
      tpu.vector_store %arg4[%c0_16, %c0_17, %c0_18], %31 {strides = array<i32>} : memref<1x8x128xf32, #tpu.memory_space<vmem>>, vector<1x8x128xf32>,
    } else {
    }
    return
  }
  func.func @transform_0(%arg0: i32, %arg1: i32) -> (i32, i32) {
    %c1_i32 = arith.constant 1 : i32
    %0 = arith.muli %arg0, %c1_i32 : i32
    %1 = arith.addi %0, %arg1 : i32
    %c0_i32 = arith.constant 0 : i32
    %c0_i32_0 = arith.constant 0 : i32
    return %1, %c0_i32 : i32, i32
  }
  func.func @transform_1(%arg0: i32, %arg1: i32) -> (i32, i32) {
    %c1_i32 = arith.constant 1 : i32
    %0 = arith.muli %arg0, %c1_i32 : i32
    %1 = arith.addi %0, %arg1 : i32
    %c0_i32 = arith.constant 0 : i32
    %c0_i32_0 = arith.constant 0 : i32
    return %1, %c0_i32 : i32, i32
  }
  func.func @transform_2(%arg0: i32, %arg1: i32) -> (i32, i32, i32) {
    %c0_i32 = arith.constant 0 : i32
    %c0_i32_0 = arith.constant 0 : i32
    %c0_i32_1 = arith.constant 0 : i32
    return %arg0, %c0_i32, %c0_i32_0 : i32, i32, i32
  }
}

</mosaic_0001>

<bundles_post_ra>
// kernel: tpu_custom_call.1
= control target key start
LH: loop header
LB: loop body
LE: loop exit
PB: predicated region body
PF: predicated region fallthrough
CT: control target
= control target key end

     0   :  { %7 = vsyncpa [#allocation4], 0  ;;  %s843_s0 = inlined_call_operand.hbm [shape: f32[16,128], index: 0, kind: input, shape index: {}]   ;;  %s844_s1 = inlined_call_operand.hbm [shape: bf16[16,128], index: 1, kind: input, shape index: {}]   ;;  %s845_s2 = inlined_call_operand.hbm [shape: f32[2,8,128], index: 2, kind: output, shape index: {}]  }
   0x1   :  { %9 = vsyncpa [#allocation4 + $0x1], 0 }
   0x2   :  { %10 = vsyncpa [#allocation7], 0 }
   0x3   :  { %12 = vsyncpa [#allocation7 + $0x1], 0 }
   0x4   :  { %13 = vsyncpa [#allocation5], 0 }
   0x5   :  { %15 = vsyncpa [#allocation5 + $0x1], 0  ;;  %s624_s9 = smov 0   ;;  %s626_s10 = smov 0  }
   0x6   :  { %s628_s11 = smov 0   ;;  %s630_s12 = smov 0  }
   0x7   :  { %s632_s13 = smov 0   ;;  %s634_s14 = smov 0  }
   0x8 LB: > { %s371_s15 = sadd.s32 4294967295, %s604_s14   ;;  %s372_s16 = sadd.s32 4294967294, %s604_s14   ;;  %s604_s14 = sphi %s634_s14, %s21_s14   ;;  %s600_s13 = sphi %s632_s13, %s865_s13   ;;  %s596_s12 = sphi %s630_s12, %s864_s12   ;;  %s592_s11 = sphi %s628_s11, %s863_s11   ;;  %s588_s10 = sphi %s626_s10, %s862_s10   ;;  %s584_s9 = sphi %s624_s9, %s861_s9  }
   0x9   : > { %s33_s17 = sadd.s32 1, %s600_s13  ;;  %s42_s18 = sadd.s32 1, %s592_s11 }
   0xa   : > { %p35_p0 = scmp.ge.s32.totalorder %s33_s17, 2  ;;  %p49_p1 = scmp.ne.s32.totalorder %s592_s11, %s588_s10 }
   0xb   : > { %p50_p2 = scmp.eq.s32.totalorder %s604_s14, 0  ;;  %p55_p3 = scmp.ne.s32.totalorder %s588_s10, %s584_s9 }
   0xc   : > { %s867_s17 = smov (%p35_p0, %s33_s17), 0  ;;  %p56_p5 = scmp.eq.s32.totalorder %s371_s15, 0 }
   0xd   : > { %p665_p4 = por %p50_p2, %p49_p1  ;;  %s39_s20 = ssub.s32 %s600_s13, %s867_s17 }
   0xe   : > { %p107_p6 = scmp.eq.s32.totalorder %s371_s15, 1  ;;  %p40_p7 = scmp.eq.s32.totalorder %s39_s20, 0 }
   0xf   : > { %p671_p8 = por %p56_p5, %p55_p3  ;;  %p113_p10 = scmp.eq.s32.totalorder %s372_s16, 1 }
  0x10   : > { %p675_p9 = por %p107_p6, %p49_p1  ;;  %p404_p13 = scmp.lt.s32.totalorder %s604_s14, 2 }
  0x11   : > { %s849_s21 = scalar_select %p671_p8, 1, 0 }
  0x12   : > { %s850_s22 = scalar_select %p675_p9, 1, 0 }
  0x13   : > { %s680_s23 = scalar_select %p40_p7, %s592_s11, %s42_s18  }
  0x14   : > { %p682_p11 = por %p113_p10, %p55_p3  ;;  %s689_s25 = sand.u32 1, %s592_s11  }
  0x15   : > { %s375_s26 = sshll.u32 %s689_s25, 3  ;;  %s376_s27 = sshll.u32 %s600_s13, 7 }
  0x16   : > { %s851_s24 = scalar_select %p682_p11, 1, 0 }
  0x17   : > { %s696_s30 = scalar_lea.hbm %s843_s0, %s376_s27  ;;  %s137_s3 = scalar_lea.vmem [#allocation3], %s375_s26 }
  0x18   : > { %s145_s4 = sshll.u32 %s137_s3, 4  ;;  %p702_p0 = pnand %p404_p13, %p665_p4  ;;  %s698_s4 = int_to_ptr.vmem [resolvable:$true] %s145_s4 }
  0x19   : > { %s134_s6 = scalar_lea.sflag [#allocation4], %s689_s25  ;;  %s458_s7 = scalar_lea.hbm %s696_s30, 128 }
  0x1a   : > { %p459_p3 = scmp.ne.s32.totalorder %s696_s30, %s458_s7  ;;  %p460_p5 = pneg %p702_p0 }
  0x1b   : > { %s463_s16 = scalar_lea.hbm %s843_s0, 256  ;;  %p464_p4 = scmp.lt.u32.totalorder %s696_s30, %s843_s0 }
  0x1c   : > { %p461_p6 = pnand %p460_p5, %p459_p3  ;;  %p465_p10 = scmp.lt.u32.totalorder %s463_s16, %s458_s7 }
  0x1d   : > { %p467_p12 = scmp.lt.u32.totalorder %s458_s7, %s696_s30 }
  0x1e   : > { %p462_p7 = pneg %p461_p6  ;;  %p466_p13 = por %p465_p10, %p464_p4 }
  0x20   : > { %p468_p1 = por %p467_p12, %p466_p13 }
  0x22   : > { %p469_p2 = pnand %p468_p1, %p462_p7 }
  0x24   : > { %472 = shalt.err (!%p469_p2)
}
  0x25   : > { %s473_s20 = scalar_lea.vmem %s698_s4, 128  ;;  %s606_s26 = smov [#allocation3]  }
  0x26   : > { %p474_p3 = scmp.ne.s32.totalorder %s698_s4, %s473_s20  ;;  %s478_s27 = sshll.u32 %s606_s26, 4  ;;  %s479_s27 = int_to_ptr.vmem [resolvable:$false] %s478_s27 }
  0x27   : > { %s480_s28 = scalar_lea.vmem %s479_s27, 256  ;;  %p481_p9 = scmp.lt.s32.totalorder %s698_s4, %s479_s27 }
  0x28   : > { %p476_p6 = pnand %p474_p3, %p460_p5  ;;  %p482_p4 = scmp.lt.s32.totalorder %s480_s28, %s473_s20 }
  0x2a   : > { %p477_p11 = pneg %p476_p6  ;;  %p483_p10 = por %p482_p4, %p481_p9 }
  0x2c   : > { %p484_p12 = pnand %p483_p10, %p477_p11 }
  0x2e   : > { %487 = shalt.err (!%p484_p12)
}
  0x2f   : > { %396 = dma.hbm_to_vmem [thread:$0]  (!%p702_p0), %s696_s30, 128, %s698_s4, %s134_s6  }
  0x30   : > { %p853_p1 = scmp.lt.s32.totalorder %s604_s14, 3  ;;  %p854_p2 = scmp.ge.s32.totalorder %s604_s14, 1 }
  0x31   : > { %s377_s3 = sshll.u32 %s689_s25, 2  ;;  %s378_s7 = sshll.u32 %s600_s13, 6 }
  0x32   : > { %p738_p7 = pnand %p854_p2, %p853_p1  ;;  %s747_s16 = scalar_lea.hbm %s844_s1, %s378_s7 }
  0x33   : > { %s156_s18 = scalar_lea.vmem [#allocation6], %s377_s3  ;;  %s153_s30 = scalar_lea.sflag [#allocation7], %s689_s25 }
  0x34   : > { %s855_s29 = scalar_select %p738_p7, 1, 0 }
  0x35   : > { %s164_s19 = sshll.u32 %s156_s18, 4  ;;  %s488_s4 = scalar_lea.hbm %s747_s16, 64  ;;  %s165_s19 = int_to_ptr.vmem [resolvable:$true] %s164_s19 }
  0x36   : > { %p489_p9 = scmp.ne.s32.totalorder %s747_s16, %s488_s4  ;;  %s493_s26 = scalar_lea.hbm %s844_s1, 128 }
  0x37   : > { %p494_p3 = scmp.lt.u32.totalorder %s747_s16, %s844_s1  ;;  %p495_p6 = scmp.lt.u32.totalorder %s493_s26, %s488_s4 }
  0x38   : > { %p491_p11 = pnand %p489_p9, %p460_p5  ;;  %p497_p10 = scmp.lt.u32.totalorder %s488_s4, %s747_s16 }
  0x39   : > { %p496_p4 = por %p495_p6, %p494_p3 }
  0x3a   : > { %p492_p13 = pneg %p491_p11 }
  0x3b   : > { %p498_p12 = por %p497_p10, %p496_p4 }
  0x3d   : > { %p499_p1 = pnand %p498_p12, %p492_p13 }
  0x3f   : > { %502 = shalt.err (!%p499_p1)
}
  0x40   : > { %s503_s25 = scalar_lea.vmem %s165_s19, 64  ;;  %s607_s3 = smov [#allocation6]  }
  0x41   : > { %p504_p2 = scmp.ne.s32.totalorder %s165_s19, %s503_s25  ;;  %s508_s7 = sshll.u32 %s607_s3, 4  ;;  %s509_s7 = int_to_ptr.vmem [resolvable:$false] %s508_s7 }
  0x42   : > { %s510_s8 = scalar_lea.vmem %s509_s7, 128  ;;  %p511_p8 = scmp.lt.s32.totalorder %s165_s19, %s509_s7 }
  0x43   : > { %p506_p9 = pnand %p504_p2, %p460_p5  ;;  %p512_p7 = scmp.lt.s32.totalorder %s510_s8, %s503_s25 }
  0x45   : > { %p507_p11 = pneg %p506_p9  ;;  %p513_p3 = por %p512_p7, %p511_p8 }
  0x47   : > { %p514_p6 = pnand %p513_p3, %p507_p11 }
  0x49   : > { %517 = shalt.err (!%p514_p6)
}
  0x4a   : > { %399 = dma.hbm_to_vmem [thread:$0]  (!%p702_p0), %s747_s16, 64, %s165_s19, %s153_s30  }
  0x4b   : > { %p856_p13 = scmp.ne.s32.totalorder %s855_s29, 0 }
  0x4c   : > { %s772_s15 = sand.u32 (!%p856_p13), 1, %s588_s10   ;;  %p857_p8 = scmp.ne.s32.totalorder (!%p856_p13), %s849_s21, 0 }
  0x4d   : > { %173 = sbr.rel (%p856_p13) target bundleno = 140 (0x8c), region = 28  ;;  %s380_s18 = sshll.u32 (!%p856_p13), %s772_s15, 3 }
  0x4e   : > { %s176_s4 = scalar_lea.sflag (!%p856_p13), [#allocation4], %s772_s15  ;;  %s179_s6 = scalar_lea.vmem (!%p856_p13), [#allocation3], %s380_s18 }
  0x54   : > { %571 = dma.done.wait (%p857_p8), %s176_s4, 128  }
  0x55   : > { %573 = vsyncadd (%p857_p8), %s176_s4, 4294967168  ;;  %s381_s5 = sshll.u32 %s772_s15, 2  ;;  %s185_s29 = scalar_lea.sflag [#allocation7], %s772_s15 }
  0x56   : > { %s188_s16 = scalar_lea.vmem [#allocation6], %s381_s5 }
  0x57   : > { %575 = dma.done.wait (%p857_p8), %s185_s29, 64  }
  0x58   : > { %577 = vsyncadd (%p857_p8), %s185_s29, 4294967232  ;;  %v221_v0 = vld [vmem:[%s179_s6] sm:$0xff]  ;;  %v222_v4 = vld [vmem:[%s188_s16] sm:$0xf]  ;;  %s213_s21 = scalar_lea.vmem [#allocation8], %s380_s18  ;;  %s384_s30 = sshll.u32 %s596_s12, 7 }
  0x59   : > { %v230_v1 = vand.u32 2147483647, %v221_v0  ;;  %v223_v5 = vunpack.c.l.bf16 %v222_v4  ;;  %v227_v12 = vmax.f32 %v221_v0, 0.0  ;;  %s268_s19 = sshll.u32 %s213_s21, 4  ;;  %s796_s27 = scalar_lea.hbm %s845_s2, %s384_s30  ;;  %s791_s19 = int_to_ptr.vmem [resolvable:$true] %s268_s19 }
  0x5a   : > { %s255_s28 = scalar_lea.sflag [#allocation5], %s772_s15  ;;  %s518_s25 = scalar_lea.vmem %s791_s19, 128 }
  0x5b   : > { %v231_v2 = vsub.f32 0.0, %v230_v1  ;;  %v225_v7 = vadd.f32 1.0, %v223_v5  ;;  %v224_v19 = vand.u32 2147483647, %v223_v5  ;;  %p519_p0 = scmp.ne.s32.totalorder %s791_s19, %s518_s25  ;;  %p858_p5 = scmp.ne.s32.totalorder %s850_s22, 0 }
  0x5c   : > { %s608_s12 = smov [#allocation8]  }
  0x5d   : > { %v232_v3 = vmul.f32 1.442695, %v231_v2  ;;  %v226_v10 = vmul.f32 0.5, %v225_v7  ;;  %p520_p7 = pnand %p519_p0, %p858_p5  ;;  %s522_s3 = sshll.u32 %s608_s12, 4  ;;  %s523_s3 = int_to_ptr.vmem [resolvable:$false] %s522_s3 }
  0x5e   : > { %s524_s7 = scalar_lea.vmem %s523_s3, 256  ;;  %p525_p10 = scmp.lt.s32.totalorder %s791_s19, %s523_s3 }
  0x5f   : > { %454 = vpow2.f32 %v232_v3  ;;  %v228_v13 = vmul.f32 %v226_v10, %v221_v0  ;;  %p521_p4 = pneg %p520_p7  ;;  %p526_p12 = scmp.lt.s32.totalorder %s524_s7, %s518_s25 }
  0x61   : > { %v229_v17 = vsub.f32 %v227_v12, %v228_v13  ;;  %p527_p1 = por %p526_p12, %p525_p10 }
  0x63   : > { %p528_p2 = pnand %p527_p1, %p521_p4 }
  0x69   : > { %v455_v6 = vpop.eup %454 }
  0x6a   : > { %v234_v8 = vadd.f32 1.0, %v455_v6  ;;  %v237_v9 = vmul.f32 -0.5, %v455_v6  ;;  %v240_v14 = vand.u32 2147483647, %v455_v6 }
  0x6c   : > { %456 = vlog2.f32 %v234_v8  ;;  %v238_v11 = vadd.f32 1.0, %v237_v9  ;;  %vm241_vm0 = vcmp.lt.f32.partialorder %v240_v14, 0.0004427343 }
  0x6e   : > { %v239_v15 = vmul.f32 %v455_v6, %v238_v11 }
  0x76   : > { %v457_v16 = vpop.eup %456 }
  0x77   : > { %v236_v18 = vmul.f32 0.6931472, %v457_v16 }
  0x79   : > { %v242_v20 = vsel %vm241_vm0, %v239_v15, %v236_v18 }
  0x7a   : > { %v243_v21 = vadd.f32 %v242_v20, %v229_v17 }
  0x7c   : > { %v244_v22 = vmul.f32 %v243_v21, %v224_v19 }
  0x7e   : > { %253 = vst [vmem:[%s213_s21] sm:$0xff] %v244_v22 }
  0x7f   : > { %531 = shalt.err (!%p528_p2)
}
  0x80   : > { %s532_s8 = scalar_lea.hbm %s796_s27, 128  ;;  %s536_s4 = scalar_lea.hbm %s845_s2, 256 }
  0x81   : > { %p533_p9 = scmp.ne.s32.totalorder %s796_s27, %s532_s8  ;;  %p537_p6 = scmp.lt.u32.totalorder %s796_s27, %s845_s2 }
  0x82   : > { %p538_p13 = scmp.lt.u32.totalorder %s536_s4, %s532_s8  ;;  %p540_p0 = scmp.lt.u32.totalorder %s532_s8, %s796_s27 }
  0x83   : > { %p534_p11 = pnand %p533_p9, %p858_p5 }
  0x84   : > { %p539_p8 = por %p538_p13, %p537_p6 }
  0x85   : > { %p535_p3 = pneg %p534_p11 }
  0x86   : > { %p541_p7 = por %p540_p0, %p539_p8 }
  0x88   : > { %p542_p4 = pnand %p541_p7, %p535_p3 }
  0x8a   : > { %545 = shalt.err (!%p542_p4)
}
  0x8b   : > { %391 = dma.vmem_to_hbm [thread:$0]  (%p858_p5), %s791_s19, 128, %s796_s27, %s255_s28  }
  0x8c PF: > { %s280_s29 = sand.u32 1, %s584_s9   ;;  %p859_p10 = scmp.ne.s32.totalorder %s851_s24, 0 }
  0x8d   : > { %p860_p12 = scmp.ge.s32.totalorder %s604_s14, 2  ;;  %s281_s16 = scalar_lea.sflag [#allocation5], %s280_s29 }
  0x8f   : > { %p401_p1 = pnand %p860_p12, %p859_p10 }
  0x91   : > { %579 = dma.done.wait (!%p401_p1), %s281_s16, 128  }
  0x92   : > { %581 = vsyncadd (!%p401_p1), %s281_s16, 4294967168  ;;  %s21_s14 = sadd.s32 1, %s604_s14   ;;  %s861_s9 = smov %s588_s10 }
  0x93   : > { %p18_p2 = scmp.ge.s32.totalorder %s21_s14, 4   ;;  %s862_s10 = smov %s592_s11 }
  0x94   : > { %s863_s11 = smov %s680_s23  ;;  %s864_s12 = smov %s600_s13 }
  0x95   : > { %s865_s13 = smov %s867_s17  ;;  %20 = sbr.rel (!%p18_p2) target bundleno = 8 (0x8), region = 94 }
  0x9c   :  { %286 = vsyncpa [#allocation4], 1 }
  0x9d   :  { %288 = vsyncpa [#allocation4 + $0x1], 1 }
  0x9e   :  { %289 = vsyncpa [#allocation7], 1 }
  0x9f   :  { %291 = vsyncpa [#allocation7 + $0x1], 1 }
  0xa0   :  { %292 = vsyncpa [#allocation5], 1 }
  0xa1   :  { %294 = vsyncpa [#allocation5 + $0x1], 1 }

</bundles_post_ra>
